<compile_context>
chip_gen: v6e
topology: v6e:2x2x1
jax: 0.10.0
libtpu: 0.0.40
codegen_flags: <defaults>
</compile_context>

<pallas_src>
import numpy as np
import jax
import jax.numpy as jnp
from jax.experimental import pallas as pl
from jax.experimental.pallas import tpu as pltpu

N = 16            # order of the group (8 rotations + 8 reflections)
FLAT = N * N      # 256 -> lane-dense flattened matrix

# Default batch-tile: (TB, 256) f32 output block = 2 MiB per step, which is at
# the measured roofline knee on v5e/v6e; raise to 4096/8192 on v6e/v7x if
# desired (still well inside the default scoped-VMEM budget).
TB_DEFAULT = 2048


# ---- trace-time constant table (mirrors the PyTorch precompute) ------------
def _group_mult(i, j):
    if i < 8 and j < 8:
        return (i + j) % 8
    elif i < 8 and j >= 8:
        return 8 + (i + (j - 8)) % 8
    elif i >= 8 and j < 8:
        return 8 + ((i - 8) - j) % 8
    else:
        return ((i - 8) - (j - 8)) % 8


def _build_table_np():
    tbl = np.zeros((N, N, N), dtype=np.float32)
    for i in range(N):
        for j in range(N):
            tbl[i, _group_mult(i, j), j] = 1.0
    return tbl


_TABLE_NP = _build_table_np()                     # (16, 16, 16), 16 KiB f32
_TABLE_FLAT_NP = _TABLE_NP.reshape(N, FLAT)       # (16, 256) lane-dense rows


# ---- Pallas kernel ----------------------------------------------------------
def _d8_rep_kernel(x_ref, tbl_ref, out_ref):
    # x_ref:   (TB, 1)   int32 group indices for this tile
    # tbl_ref: (16, 256) f32 VMEM-resident table (constant index_map)
    # out_ref: (TB, 256) output tile (flattened 16x16 matrices)
    x = jnp.clip(x_ref[...], 0, N - 1)                       # fused OOB guard
    cols = jax.lax.broadcasted_iota(jnp.int32, (x.shape[0], N), 1)
    onehot = (x == cols).astype(jnp.float32)                  # (TB, 16) on VPU
    out = jnp.dot(onehot, tbl_ref[...],
                  preferred_element_type=jnp.float32)         # (TB, 256) on MXU
    out_ref[...] = out.astype(out_ref.dtype)


def _round_up(a, m):
    return (a + m - 1) // m * m


def d8_regular_representation_batched(x, dtype=jnp.float32, tb=TB_DEFAULT):
    """x: integer array of shape (B,) -> (B, 16, 16) permutation matrices."""
    x = jnp.asarray(x, jnp.int32).reshape(-1)
    B = int(x.shape[0])
    if B == 0:
        return jnp.zeros((0, N, N), dtype)

    # Batch tile: multiple of 8 sublanes; shrink for small batches.
    TB = min(_round_up(B, 8), _round_up(max(int(tb), 8), 8))
    B_pad = _round_up(B, TB)
    if B_pad != B:
        x = jnp.pad(x, (0, B_pad - B))        # pad with index 0 (valid)
    x2 = x.reshape(B_pad, 1)

    table = jnp.asarray(_TABLE_FLAT_NP, jnp.float32)   # (16, 256) constant

    out_flat = pl.pallas_call(
        _d8_rep_kernel,
        out_shape=jax.ShapeDtypeStruct((B_pad, FLAT), dtype),
        grid=(B_pad // TB,),
        in_specs=[
            # Per-tile slice of the index vector (TB rows, 1 lane = full dim).
            pl.BlockSpec((TB, 1), lambda i: (i, 0)),
            # Whole table, constant block index -> DMA'd once, VMEM-resident.
            pl.BlockSpec((N, FLAT), lambda i: (0, 0)),
        ],
        # Sublane/lane-dense output block: TB multiple of 8, 256 lanes.
        out_specs=pl.BlockSpec((TB, FLAT), lambda i: (i, 0)),
        compiler_params=pltpu.CompilerParams(
            dimension_semantics=("parallel",)),   # v7x: split tiles across TCs
    )(x2, table)

    return out_flat[:B].reshape(B, N, N)


def d8_regular_representation(x, dtype=jnp.float32):
    """Single-index forward (module's original signature) -> (16, 16).

    Per the performance review this path skips Pallas: moving one 1 KiB
    matrix through a pallas_call is pure launch overhead; a plain constant
    gather is negligible cost.
    """
    table = jnp.asarray(_TABLE_NP, dtype)                 # (16, 16, 16)
    idx = jnp.clip(jnp.asarray(x, jnp.int32).reshape(()), 0, N - 1)
    return table[idx]


# ---- pure-Python reference (mirrors the PyTorch module exactly) ------------
def _ref_matrix(i):
    M = np.zeros((N, N), dtype=np.float32)
    for j in range(N):
        M[_group_mult(i, j), j] = 1.0
    return M


if __name__ == "__main__":
    key = jax.random.PRNGKey(0)
    ok = True

    # Deterministic example batch of group indices (small shapes).
    x_batch = jax.random.randint(key, (8,), 0, N)
    out_batch = jax.block_until_ready(
        d8_regular_representation_batched(x_batch))
    if out_batch.shape != (8, N, N) or out_batch.dtype != jnp.float32:
        ok = False
        print("Bad output shape/dtype for batched call")
    xb = np.asarray(x_batch)
    for b in range(xb.shape[0]):
        if not np.array_equal(np.asarray(out_batch[b]), _ref_matrix(int(xb[b]))):
            ok = False
            print(f"MISMATCH in batched output at position {b} (x={int(xb[b])})")
            break

    # Exhaustive check: all 16 group elements in one call.
    all_out = jax.block_until_ready(
        d8_regular_representation_batched(jnp.arange(N, dtype=jnp.int32)))
    for i in range(N):
        if not np.array_equal(np.asarray(all_out[i]), _ref_matrix(i)):
            ok = False
            print(f"MISMATCH at group index {i}")
            break

    # Multi-step grid + padding path (grid > 1, B not a multiple of the tile).
    key2 = jax.random.PRNGKey(1)
    x_big = jax.random.randint(key2, (20,), 0, N)
    out_big = jax.block_until_ready(
        d8_regular_representation_batched(x_big, tb=8))
    xbg = np.asarray(x_big)
    for b in range(xbg.shape[0]):
        if not np.array_equal(np.asarray(out_big[b]), _ref_matrix(int(xbg[b]))):
            ok = False
            print(f"MISMATCH in multi-tile output at position {b}")
            break

    # Single-index forward path (module's original signature).
    single = jax.block_until_ready(d8_regular_representation(int(xb[0])))
    if not np.array_equal(np.asarray(single), _ref_matrix(int(xb[0]))):
        ok = False
        print("MISMATCH in single-index forward")

    if ok:
        print("KERNEL_OK")
</pallas_src>

<mosaic_0001>
module attributes {stable_mosaic.version = 11 : i64} {
  func.func @_d8_rep_kernel(%arg0: i32, %arg1: memref<8x1xi32, #tpu.memory_space<vmem>>, %arg2: memref<16x256xf32, #tpu.memory_space<vmem>>, %arg3: memref<8x256xf32, #tpu.memory_space<vmem>>) attributes {dimension_semantics = [#tpu.dimension_semantics<parallel>], iteration_bounds = array<i64: 1>, scalar_prefetch = 0 : i64, scratch_operands = 0 : i64, tpu.core_type = #tpu.core_type<tc>, window_params = [{transform_indices = @transform_0, window_bounds = array<i64: 8, 1>}, {pipeline_mode = #tpu.pipeline_mode<synchronous>, transform_indices = @transform_1, window_bounds = array<i64: 16, 256>}, {transform_indices = @transform_2, window_bounds = array<i64: 8, 256>}]} {
    %c0 = arith.constant 0 : index
    %c0_0 = arith.constant 0 : index
    %0 = vector.load %arg1[%c0, %c0_0] : memref<8x1xi32, #tpu.memory_space<vmem>>, vector<8x1xi32>
    %c0_i32 = arith.constant 0 : i32
    %c15_i32 = arith.constant 15 : i32
    %1 = vector.broadcast %c0_i32 : i32 to vector<8x1xi32>
    %2 = arith.maxsi %1, %0 : vector<8x1xi32>
    %3 = vector.broadcast %c15_i32 : i32 to vector<8x1xi32>
    %4 = arith.minsi %3, %2 : vector<8x1xi32>
    %5 = tpu.iota {dimensions = array<i32: 1>} : vector<8x16xi32>
    %6 = vector.broadcast %4 : vector<8x1xi32> to vector<8x16xi32>
    %7 = arith.cmpi eq, %6, %5 : vector<8x16xi32>
    %8 = arith.extui %7 : vector<8x16xi1> to vector<8x16xi32>
    %9 = arith.sitofp %8 : vector<8x16xi32> to vector<8x16xf32>
    %c0_1 = arith.constant 0 : index
    %c0_2 = arith.constant 0 : index
    %10 = vector.load %arg2[%c0_1, %c0_2] : memref<16x256xf32, #tpu.memory_space<vmem>>, vector<16x256xf32>
    %cst = arith.constant dense<0.000000e+00> : vector<8x256xf32>
    %11 = tpu.matmul %9, %10, %cst {dimension_numbers = #tpu.dot_dimension_numbers<[1], [0], [0], [1], [0, 0, 1, 1], [], []>} : vector<8x16xf32>, vector<16x256xf32>, vector<8x256xf32> -> vector<8x256xf32>
    %c0_3 = arith.constant 0 : index
    %c0_4 = arith.constant 0 : index
    %12 = vector.load %arg3[%c0_3, %c0_4] : memref<8x256xf32, #tpu.memory_space<vmem>>, vector<8x256xf32>
    tpu.vector_store %arg3[%c0_3, %c0_4], %11 {strides = array<i32>} : memref<8x256xf32, #tpu.memory_space<vmem>>, vector<8x256xf32>,
    return
  }
  func.func @transform_0(%arg0: i32) -> (i32, i32) {
    %c0_i32 = arith.constant 0 : i32
    %c0_i32_0 = arith.constant 0 : i32
    return %arg0, %c0_i32 : i32, i32
  }
  func.func @transform_1(%arg0: i32) -> (i32, i32) {
    %c0_i32 = arith.constant 0 : i32
    %c0_i32_0 = arith.constant 0 : i32
    %c0_i32_1 = arith.constant 0 : i32
    return %c0_i32, %c0_i32_0 : i32, i32
  }
  func.func @transform_2(%arg0: i32) -> (i32, i32) {
    %c0_i32 = arith.constant 0 : i32
    %c0_i32_0 = arith.constant 0 : i32
    return %arg0, %c0_i32 : i32, i32
  }
}

</mosaic_0001>

<bundles_post_ra>
// kernel: tpu_custom_call.1
= control target key start
LH: loop header
LB: loop body
LE: loop exit
PB: predicated region body
PF: predicated region fallthrough
CT: control target
= control target key end

     0   :  { %7 = vsyncpa [#allocation3], 0  ;;  %s218_s0 = inlined_call_operand.vmem [shape: s32[8,1], index: 0, kind: input, shape index: {}]   ;;  %s219_s1 = inlined_call_operand.hbm [shape: f32[16,256], index: 1, kind: input, shape index: {}]   ;;  %s220_s2 = inlined_call_operand.hbm [shape: f32[8,256], index: 2, kind: output, shape index: {}]  }
   0x1   :  { %8 = vsyncpa [#allocation4], 0  ;;  %s188_s9 = smov [#allocation2]  }
   0x2   :  { %s16_s10 = sshll.u32 %s188_s9, 4  ;;  %s17_s10 = int_to_ptr.vmem [resolvable:$true] %s16_s10 }
   0x3   :  { %s152_s11 = scalar_lea.vmem %s17_s10, 512  ;;  %p157_p1 = scmp.lt.s32.totalorder %s17_s10, %s17_s10 }
   0x4   :  { %p153_p0 = scmp.ne.s32.totalorder %s17_s10, %s152_s11  ;;  %p158_p2 = scmp.lt.s32.totalorder %s152_s11, %s152_s11 }
   0x6   :  { %p159_p3 = por %p158_p2, %p157_p1 }
   0x8   :  { %p160_p4 = pnand %p159_p3, %p153_p0 }
   0xa   :  { %163 = shalt.err (!%p160_p4)
}
   0xb   :  { %s189_s12 = smov 256   ;;  %s190_s13 = smov 16  }
   0xc   :  { %22 = dma.hbm_to_vmem [thread:$0]  %s219_s1, 512, %s17_s10, [#allocation3], %s189_s12, %s189_s12, %s190_s13  }
   0xd   :  { %184 = dma.done.wait [#allocation3], 512  }
   0xe   :  { %185 = vsyncadd [#allocation3], 4294966784  ;;  %v191_v0 = vmov 0   ;;  %v26_v1 = vld [vmem:[%s218_s0] sm:$0xff]  ;;  %v42_v2 = vld [vmem:[#allocation2 + $0x18] sm:$0xff]  ;;  %v192_v7 = vmov 0.0   ;;  %v31_v9 = vlaneseq }
   0xf   :  { %143 = vset.pattern.permute.xlu0 %v191_v0  ;;  %v41_v3 = vld [vmem:[#allocation2 + $0x10] sm:$0xff]  ;;  %vm27_vm0 = vcmp.gt.s32.totalorder %v26_v1, 0  ;;  %75 = vmatprep.subr.mxu0 %v42_v2  ;;  %v40_v4 = vld [vmem:[#allocation2 + $0x8] sm:$0xff]  ;;  %v39_v5 = vld [vmem:[#allocation2] sm:$0xff]  ;;  %vm43_vm2 = vcmask 130048   ;;  %s193_s0 = smov [#allocation5]  }
  0x10   :  { %v28_v6 = vsel %vm27_vm0, %v26_v1, 0  ;;  %76 = vmatpush1.msra.mxu0 %v41_v3  ;;  %111 = vmatprep.mubr.f32.mxu0 %v192_v7  ;;  %v32_v10 = vand.u32 127, %v31_v9  ;;  %s126_s1 = sshll.u32 %s193_s0, 4  ;;  %s127_s1 = int_to_ptr.vmem [resolvable:$true] %s126_s1 }
  0x11   :  { %vm29_vm1 = vcmp.lt.s32.totalorder %v28_v6, 15  ;;  %77 = vmatprep.subr.mxu0 %v40_v4  ;;  %s164_s18 = scalar_lea.vmem %s127_s1, 256  ;;  %p169_p6 = scmp.lt.s32.totalorder %s127_s1, %s127_s1 }
  0x12   :  { %v30_v8 = vsel %vm29_vm1, %v28_v6, 15  ;;  %78 = vmatpush1.msra.mxu0 %v39_v5  ;;  %p165_p5 = scmp.ne.s32.totalorder %s127_s1, %s164_s18  ;;  %p170_p7 = scmp.lt.s32.totalorder %s164_s18, %s164_s18 }
  0x13   :  { %34 = vperm.xlu0 %143, %v30_v8  }
  0x14   :  { %p171_p8 = por %p170_p7, %p169_p6 }
  0x16   :  { %p172_p9 = pnand %p171_p8, %p165_p5 }
  0x8e   :  { %v35_v11 = vpop.permute.xlu0 %34 }
  0x8f   :  { %vm36_vm3 = vcmp.eq.s32.totalorder %v35_v11, %v32_v10 }
  0x90   :  { %v135_v12 = vsel %vm36_vm3, 1.0, %v192_v7 }
  0x91   :  { %136 = vmatmul.mubr.msk.f32.vlgmr.msra.gmra.mxu0 %vm43_vm2, %v135_v12 }
 0x151   :  { %v113_v13 = vpop.f32.mrf.mxu0 }
 0x152   :  { %118 = vst [vmem:[#allocation5] sm:$0xff] %v113_v13 }
 0x153   :  { %v115_v14 = vpop.f32.mrf.mxu0 }
 0x154   :  { %119 = vst [vmem:[#allocation5 + $0x8] sm:$0xff] %v115_v14 }
 0x155   :  { %175 = shalt.err (!%p172_p9)
}
 0x156   :  { %129 = dma.vmem_to_hbm [thread:$0]  %s127_s1, 256, %s220_s2, [#allocation4]  }
 0x157   :  { %186 = dma.done.wait [#allocation4], 256  }
 0x158   :  { %187 = vsyncadd [#allocation4], 4294967040 }
 0x159   :  { %133 = vsyncpa [#allocation3], 1 }
 0x15a   :  { %134 = vsyncpa [#allocation4], 1 }

</bundles_post_ra>
